<compile_context>
chip_gen: v5e
topology: v5e:2x2
jax: 0.10.0
libtpu: 0.0.40
codegen_flags: <defaults>
</compile_context>

<pallas_src>
import jax
import jax.numpy as jnp
import numpy as np
from jax import lax
from jax.experimental import pallas as pl
from jax.experimental.pallas import tpu as pltpu

L = 64              # conv sequence length (from x.view(-1, 1, 64))
C_OUT = 16          # conv output channels
POOLED = 32         # length after MaxPool1d(kernel_size=2, stride=2)
N_OUT = 77          # fc output features
N_PAD = 128         # lane-dense padded fc output width
LW = C_OUT * L      # 1024 wide-slab lanes (channel-major: lane = o*64 + t)
TB_MAX = 256        # batch tile (keeps intermediates well under VMEM limits)


def _round_up(n, m):
    return (n + m - 1) // m * m


def net_kernel(x_ref, cw_ref, fcw_ref, fcb_ref, out_ref):
    x = x_ref[...]                                   # (TB, 64) f32
    # Lane-tile x across the 16 channels: lane l = o*64 + t holds x[:, t].
    xw = jnp.tile(x, (1, C_OUT))                     # (TB, 1024)

    lane = lax.broadcasted_iota(jnp.int32, (1, LW), 1)
    t = jnp.bitwise_and(lane, L - 1)                 # time position within channel

    # Conv1d taps via XLU lane rolls; boundary lanes masked to 0 (padding=1).
    xl = jnp.where(t == 0, 0.0, pltpu.roll(xw, shift=1, axis=1))        # x[t-1]
    xr = jnp.where(t == L - 1, 0.0, pltpu.roll(xw, shift=LW - 1, axis=1))  # x[t+1]

    # Per-lane conv weights/bias (rows: w_left, w_mid, w_right, bias), + ReLU.
    co = (cw_ref[0:1, :] * xl + cw_ref[1:2, :] * xw + cw_ref[2:3, :] * xr
          + cw_ref[3:4, :])                          # (TB, 1024)
    co = jnp.maximum(co, 0.0)

    # MaxPool1d(2,2): pairwise max with left-shifted signal. Valid results sit
    # on even-t lanes; odd-t lanes (and cross-channel wrap at t=63) hold finite
    # junk that is annihilated by the zeroed rows of the expanded fc weight.
    pm = jnp.maximum(co, pltpu.roll(co, shift=LW - 1, axis=1))

    # Single fused MXU matmul (K=1024, N=128) + bias.
    out_ref[...] = (
        jnp.dot(pm, fcw_ref[...], preferred_element_type=jnp.float32)
        + fcb_ref[...])


def init_params(key):
    """Deterministic init mirroring the PyTorch module's parameter shapes."""
    k1, k2, k3, k4 = jax.random.split(key, 4)
    bc = 1.0 / np.sqrt(1 * 3)                 # conv fan_in = in_ch * k
    w1 = jax.random.uniform(k1, (C_OUT, 3), jnp.float32, -bc, bc)   # (16,1,3)->(16,3)
    b1 = jax.random.uniform(k2, (C_OUT,), jnp.float32, -bc, bc)
    bf = 1.0 / np.sqrt(C_OUT * POOLED)        # fc fan_in = 512
    # stored as (512, 77) == torch fc.weight.T
    w_fc = jax.random.uniform(k3, (C_OUT * POOLED, N_OUT), jnp.float32, -bf, bf)
    b_fc = jax.random.uniform(k4, (N_OUT,), jnp.float32, -bf, bf)
    return w1, b1, w_fc, b_fc


def net_forward(x, w1, b1, w_fc, b_fc):
    x = x.reshape(-1, L).astype(jnp.float32)         # torch: x.view(-1, 1, 64)
    B = x.shape[0]
    TB = min(TB_MAX, _round_up(B, 8))
    B_pad = _round_up(B, TB)
    if B_pad != B:
        x = jnp.pad(x, ((0, B_pad - B), (0, 0)))

    # Per-lane conv params for the channel-major 1024-lane slab.
    cw = jnp.stack([
        jnp.repeat(w1[:, 0], L),
        jnp.repeat(w1[:, 1], L),
        jnp.repeat(w1[:, 2], L),
        jnp.repeat(b1, L),
    ], axis=0).astype(jnp.float32)                   # (4, 1024)

    # Expanded FC weight: row o*64 + 2j carries w_fc[o*32 + j, :]; odd rows are
    # zero (kill junk pool lanes); output padded to 128 lanes (cols 77..127 = 0).
    w_exp = jnp.zeros((C_OUT, POOLED, 2, N_PAD), jnp.float32)
    w_exp = w_exp.at[:, :, 0, :N_OUT].set(w_fc.reshape(C_OUT, POOLED, N_OUT))
    w_exp = w_exp.reshape(LW, N_PAD)                 # (1024, 128)
    fcb = jnp.zeros((1, N_PAD), jnp.float32).at[0, :N_OUT].set(b_fc)

    grid = (B_pad // TB,)
    out = pl.pallas_call(
        net_kernel,
        out_shape=jax.ShapeDtypeStruct((B_pad, N_PAD), jnp.float32),
        grid=grid,
        in_specs=[
            pl.BlockSpec((TB, L), lambda i: (i, 0)),        # x batch tile
            pl.BlockSpec((4, LW), lambda i: (0, 0)),        # per-lane conv params
            pl.BlockSpec((LW, N_PAD), lambda i: (0, 0)),    # expanded fc weight
            pl.BlockSpec((1, N_PAD), lambda i: (0, 0)),     # fc bias (padded)
        ],
        out_specs=pl.BlockSpec((TB, N_PAD), lambda i: (i, 0)),
        compiler_params=pltpu.CompilerParams(
            dimension_semantics=("parallel",)),             # 2 TCs on v7x
    )(x, cw, w_exp, fcb)
    return out[:B, :N_OUT]


def net_reference(x, w1, b1, w_fc, b_fc):
    """Pure-JAX reference matching the PyTorch forward."""
    x = x.reshape(-1, L).astype(jnp.float32)
    xp = jnp.pad(x, ((0, 0), (1, 1)))                 # pad=1 along time
    conv = (w1[:, 0][None, :, None] * xp[:, None, 0:L]
            + w1[:, 1][None, :, None] * xp[:, None, 1:L + 1]
            + w1[:, 2][None, :, None] * xp[:, None, 2:L + 2]
            + b1[None, :, None])                      # (B, 16, 64)
    conv = jnp.maximum(conv, 0.0)
    pooled = conv.reshape(-1, C_OUT, POOLED, 2).max(-1)   # (B, 16, 32)
    flat = pooled.reshape(-1, C_OUT * POOLED)             # (B, 512)
    return flat @ w_fc + b_fc[None, :]


if __name__ == "__main__":
    key = jax.random.PRNGKey(0)
    k_x, k_p = jax.random.split(key)
    x = jax.random.normal(k_x, (2, 64), jnp.float32)       # batch=2, 64 features
    w1, b1, w_fc, b_fc = init_params(k_p)

    out = net_forward(x, w1, b1, w_fc, b_fc)
    out = jax.block_until_ready(out)

    ref = net_reference(x, w1, b1, w_fc, b_fc)
    assert out.shape == (2, N_OUT), out.shape
    np.testing.assert_allclose(np.asarray(out), np.asarray(ref),
                               rtol=1e-4, atol=1e-4)
    print("KERNEL_OK")
</pallas_src>

<mosaic_0001>
module attributes {stable_mosaic.version = 11 : i64} {
  func.func @net_kernel(%arg0: i32, %arg1: memref<8x64xf32, #tpu.memory_space<vmem>>, %arg2: memref<4x1024xf32, #tpu.memory_space<vmem>>, %arg3: memref<1024x128xf32, #tpu.memory_space<vmem>>, %arg4: memref<1x128xf32, #tpu.memory_space<vmem>>, %arg5: memref<8x128xf32, #tpu.memory_space<vmem>>) attributes {dimension_semantics = [#tpu.dimension_semantics<parallel>], iteration_bounds = array<i64: 1>, scalar_prefetch = 0 : i64, scratch_operands = 0 : i64, tpu.core_type = #tpu.core_type<tc>, window_params = [{transform_indices = @transform_0, window_bounds = array<i64: 8, 64>}, {pipeline_mode = #tpu.pipeline_mode<synchronous>, transform_indices = @transform_1, window_bounds = array<i64: 4, 1024>}, {pipeline_mode = #tpu.pipeline_mode<synchronous>, transform_indices = @transform_2, window_bounds = array<i64: 1024, 128>}, {pipeline_mode = #tpu.pipeline_mode<synchronous>, transform_indices = @transform_3, window_bounds = array<i64: 1, 128>}, {transform_indices = @transform_4, window_bounds = array<i64: 8, 128>}]} {
    %c0 = arith.constant 0 : index
    %c0_0 = arith.constant 0 : index
    %0 = vector.load %arg1[%c0, %c0_0] : memref<8x64xf32, #tpu.memory_space<vmem>>, vector<8x64xf32>
    %1 = tpu.concatenate %0, %0, %0, %0, %0, %0, %0, %0, %0, %0, %0, %0, %0, %0, %0, %0 in 1 : vector<8x64xf32>, vector<8x64xf32>, vector<8x64xf32>, vector<8x64xf32>, vector<8x64xf32>, vector<8x64xf32>, vector<8x64xf32>, vector<8x64xf32>, vector<8x64xf32>, vector<8x64xf32>, vector<8x64xf32>, vector<8x64xf32>, vector<8x64xf32>, vector<8x64xf32>, vector<8x64xf32>, vector<8x64xf32> -> vector<8x1024xf32>
    %2 = tpu.iota {dimensions = array<i32: 1>} : vector<1x1024xi32>
    %c63_i32 = arith.constant 63 : i32
    %3 = vector.broadcast %c63_i32 : i32 to vector<1x1024xi32>
    %4 = arith.andi %2, %3 : vector<1x1024xi32>
    %c0_i32 = arith.constant 0 : i32
    %5 = vector.broadcast %c0_i32 : i32 to vector<1x1024xi32>
    %6 = arith.cmpi eq, %4, %5 : vector<1x1024xi32>
    %c1_i32 = arith.constant 1 : i32
    %7 = tpu.dynamic_rotate %1 by %c1_i32 dim 1 : vector<8x1024xf32>, i32 -> vector<8x1024xf32>
    %cst = arith.constant 0.000000e+00 : f32
    %8 = vector.shape_cast %6 : vector<1x1024xi1> to vector<1x1024xi1>
    %9 = vector.broadcast %8 : vector<1x1024xi1> to vector<8x1024xi1>
    %10 = vector.broadcast %cst : f32 to vector<8x1024xf32>
    %11 = arith.select %9, %10, %7 : vector<8x1024xi1>, vector<8x1024xf32>
    %c63_i32_1 = arith.constant 63 : i32
    %12 = vector.broadcast %c63_i32_1 : i32 to vector<1x1024xi32>
    %13 = arith.cmpi eq, %4, %12 : vector<1x1024xi32>
    %c1023_i32 = arith.constant 1023 : i32
    %14 = tpu.dynamic_rotate %1 by %c1023_i32 dim 1 : vector<8x1024xf32>, i32 -> vector<8x1024xf32>
    %cst_2 = arith.constant 0.000000e+00 : f32
    %15 = vector.shape_cast %13 : vector<1x1024xi1> to vector<1x1024xi1>
    %16 = vector.broadcast %15 : vector<1x1024xi1> to vector<8x1024xi1>
    %17 = vector.broadcast %cst_2 : f32 to vector<8x1024xf32>
    %18 = arith.select %16, %17, %14 : vector<8x1024xi1>, vector<8x1024xf32>
    %c0_3 = arith.constant 0 : index
    %c0_4 = arith.constant 0 : index
    %19 = vector.load %arg2[%c0_3, %c0_4] : memref<4x1024xf32, #tpu.memory_space<vmem>>, vector<1x1024xf32>
    %20 = vector.broadcast %19 : vector<1x1024xf32> to vector<8x1024xf32>
    %21 = arith.mulf %20, %11 : vector<8x1024xf32>
    %c1 = arith.constant 1 : index
    %c0_5 = arith.constant 0 : index
    %22 = vector.load %arg2[%c1, %c0_5] : memref<4x1024xf32, #tpu.memory_space<vmem>>, vector<1x1024xf32>
    %23 = vector.broadcast %22 : vector<1x1024xf32> to vector<8x1024xf32>
    %24 = arith.mulf %23, %1 : vector<8x1024xf32>
    %25 = arith.addf %21, %24 : vector<8x1024xf32>
    %c2 = arith.constant 2 : index
    %c0_6 = arith.constant 0 : index
    %26 = vector.load %arg2[%c2, %c0_6] : memref<4x1024xf32, #tpu.memory_space<vmem>>, vector<1x1024xf32>
    %27 = vector.broadcast %26 : vector<1x1024xf32> to vector<8x1024xf32>
    %28 = arith.mulf %27, %18 : vector<8x1024xf32>
    %29 = arith.addf %25, %28 : vector<8x1024xf32>
    %c3 = arith.constant 3 : index
    %c0_7 = arith.constant 0 : index
    %30 = vector.load %arg2[%c3, %c0_7] : memref<4x1024xf32, #tpu.memory_space<vmem>>, vector<1x1024xf32>
    %31 = vector.broadcast %30 : vector<1x1024xf32> to vector<8x1024xf32>
    %32 = arith.addf %29, %31 : vector<8x1024xf32>
    %cst_8 = arith.constant 0.000000e+00 : f32
    %33 = vector.broadcast %cst_8 : f32 to vector<8x1024xf32>
    %34 = arith.maximumf %32, %33 : vector<8x1024xf32>
    %c1023_i32_9 = arith.constant 1023 : i32
    %35 = tpu.dynamic_rotate %34 by %c1023_i32_9 dim 1 : vector<8x1024xf32>, i32 -> vector<8x1024xf32>
    %36 = arith.maximumf %34, %35 : vector<8x1024xf32>
    %c0_10 = arith.constant 0 : index
    %c0_11 = arith.constant 0 : index
    %37 = vector.load %arg3[%c0_10, %c0_11] : memref<1024x128xf32, #tpu.memory_space<vmem>>, vector<1024x128xf32>
    %cst_12 = arith.constant dense<0.000000e+00> : vector<8x128xf32>
    %38 = tpu.matmul %36, %37, %cst_12 {dimension_numbers = #tpu.dot_dimension_numbers<[1], [0], [0], [1], [0, 0, 1, 1], [], []>} : vector<8x1024xf32>, vector<1024x128xf32>, vector<8x128xf32> -> vector<8x128xf32>
    %c0_13 = arith.constant 0 : index
    %c0_14 = arith.constant 0 : index
    %39 = vector.load %arg4[%c0_13, %c0_14] : memref<1x128xf32, #tpu.memory_space<vmem>>, vector<1x128xf32>
    %40 = vector.broadcast %39 : vector<1x128xf32> to vector<8x128xf32>
    %41 = arith.addf %38, %40 : vector<8x128xf32>
    %c0_15 = arith.constant 0 : index
    %c0_16 = arith.constant 0 : index
    %42 = vector.load %arg5[%c0_15, %c0_16] : memref<8x128xf32, #tpu.memory_space<vmem>>, vector<8x128xf32>
    tpu.vector_store %arg5[%c0_15, %c0_16], %41 {strides = array<i32>} : memref<8x128xf32, #tpu.memory_space<vmem>>, vector<8x128xf32>,
    return
  }
  func.func @transform_0(%arg0: i32) -> (i32, i32) {
    %c0_i32 = arith.constant 0 : i32
    %c0_i32_0 = arith.constant 0 : i32
    return %arg0, %c0_i32 : i32, i32
  }
  func.func @transform_1(%arg0: i32) -> (i32, i32) {
    %c0_i32 = arith.constant 0 : i32
    %c0_i32_0 = arith.constant 0 : i32
    %c0_i32_1 = arith.constant 0 : i32
    return %c0_i32, %c0_i32_0 : i32, i32
  }
  func.func @transform_2(%arg0: i32) -> (i32, i32) {
    %c0_i32 = arith.constant 0 : i32
    %c0_i32_0 = arith.constant 0 : i32
    %c0_i32_1 = arith.constant 0 : i32
    return %c0_i32, %c0_i32_0 : i32, i32
  }
  func.func @transform_3(%arg0: i32) -> (i32, i32) {
    %c0_i32 = arith.constant 0 : i32
    %c0_i32_0 = arith.constant 0 : i32
    %c0_i32_1 = arith.constant 0 : i32
    return %c0_i32, %c0_i32_0 : i32, i32
  }
  func.func @transform_4(%arg0: i32) -> (i32, i32) {
    %c0_i32 = arith.constant 0 : i32
    %c0_i32_0 = arith.constant 0 : i32
    return %arg0, %c0_i32 : i32, i32
  }
}

</mosaic_0001>

<bundles_post_ra>
// kernel: tpu_custom_call.1
= control target key start
LH: loop header
LB: loop body
LE: loop exit
PB: predicated region body
PF: predicated region fallthrough
CT: control target
= control target key end

     0   :  { %9 = vsyncpa [#allocation3], 0  ;;  %s1138_s0 = inlined_call_operand.hbm [shape: f32[8,64], index: 0, kind: input, shape index: {}]   ;;  %s1139_s1 = inlined_call_operand.hbm [shape: f32[4,1024], index: 1, kind: input, shape index: {}]   ;;  %s1140_s2 = inlined_call_operand.hbm [shape: f32[1024,128], index: 2, kind: input, shape index: {}]   ;;  %s1141_s3 = inlined_call_operand.vmem [shape: f32[1,128], index: 3, kind: input, shape index: {}]   ;;  %s1142_s4 = inlined_call_operand.hbm [shape: f32[8,128], index: 4, kind: output, shape index: {}]  }
   0x1   :  { %10 = vsyncpa [#allocation6], 0  ;;  %s28_s17 = sshll.u32 %s1139_s1, 4  ;;  %s29_s17 = int_to_ptr.hbm [resolvable:$true] %s28_s17 }
   0x2   :  { %11 = vsyncpa [#allocation4], 0  ;;  %s760_s18 = smov [#allocation5]   ;;  %s17_s22 = sshll.u32 %s1138_s0, 4  ;;  %s18_s22 = int_to_ptr.hbm [resolvable:$true] %s17_s22 }
   0x3   :  { %s30_s19 = sshll.u32 %s760_s18, 4  ;;  %s761_s23 = smov [#allocation2]   ;;  %s31_s19 = int_to_ptr.vmem [resolvable:$true] %s30_s19 }
   0x4   :  { %33 = dma.hbm_to_vmem [thread:$0]  %s29_s17, 512, %s31_s19, [#allocation6]  }
   0x5   :  { %s19_s24 = sshll.u32 %s761_s23, 4  ;;  %s38_s27 = sshll.u32 %s1140_s2, 4  ;;  %s20_s24 = int_to_ptr.vmem [resolvable:$true] %s19_s24  ;;  %s39_s27 = int_to_ptr.hbm [resolvable:$true] %s38_s27 }
   0x6   :  { %22 = dma.hbm_to_vmem [thread:$0]  %s18_s22, 128, %s20_s24, [#allocation3]  }
   0x7   :  { %s762_s1 = smov [#allocation7]   ;;  %s763_s29 = smov 128  }
   0x8   :  { %s40_s28 = sshll.u32 %s762_s1, 4  ;;  %s764_s30 = smov 8   ;;  %s41_s28 = int_to_ptr.vmem [resolvable:$true] %s40_s28 }
   0x9   :  { %46 = dma.hbm_to_vmem [thread:$0]  %s39_s27, 16384, %s41_s28, [#allocation6], %s763_s29, %s763_s29, %s764_s30  }
   0xa   :  { %754 = dma.done.wait [#allocation3], 128  }
   0xb   :  { %755 = vsyncadd [#allocation3], 4294967168 }
   0xc   :  { %756 = dma.done.wait [#allocation6], 16896  }
   0xd   :  { %757 = vsyncadd [#allocation6], 4294950400  ;;  %v61_v0 = vld [vmem:[#allocation2] sm:$0xff]  ;;  %s765_s0 = smov 64   ;;  %vm66_vm0 = vcmask 523264   ;;  %s766_s2 = smov 127   ;;  %v68_v3 = vlaneseq }
   0xe   :  { %63 = vrot.lane.b32.xlu0 %v61_v0, %s765_s0  ;;  %s767_s5 = smov 1   ;;  %v810_v5 = vld [vmem:[#allocation5 + $0x1] ss:$4 sm:$0xff]  ;;  %v822_v18 = vld [vmem:[#allocation5] ss:$4 sm:$0xff]  ;;  %s768_s8 = smov [#allocation8]  }
   0xf   :  { %v808_v4 = vand.u32 127, %v68_v3  ;;  %v188_v8 = vperm.slane %v810_v5, 5  ;;  %v190_v9 = vperm.slane %v810_v5, 7  ;;  %v185_v12 = vperm.slane %v810_v5, 2  ;;  %v844_v29 = vld [vmem:[#allocation5 + $0x2] ss:$4 sm:$0xff] }
  0x10   :  { %v186_v15 = vperm.slane %v810_v5, 3  ;;  %v183_v16 = vperm.slane %v810_v5, 0  ;;  %v184_v17 = vperm.slane %v810_v5, 1  ;;  %v187_v21 = vperm.slane %v810_v5, 4  ;;  %v862_v36 = vld [vmem:[#allocation5 + $0x3] ss:$4 sm:$0xff] }
  0x11   :  { %v74_v6 = vadd.s32 640, %v808_v4  ;;  %v76_v7 = vadd.s32 896, %v808_v4  ;;  %v71_v10 = vadd.s32 256, %v808_v4  ;;  %v72_v11 = vadd.s32 384, %v808_v4  ;;  %v332_v53 = vld [vmem:[#allocation7 + $0x78] sm:$0xff]  ;;  %v331_v54 = vld [vmem:[#allocation7 + $0x70] sm:$0xff] }
  0x12   :  { %v70_v20 = vadd.s32 128, %v808_v4  ;;  %v189_v22 = vperm.slane %v810_v5, 6  ;;  %v161_v34 = vperm.slane %v822_v18, 5  ;;  %v163_v35 = vperm.slane %v822_v18, 7  ;;  %449 = vmatpush.msra.mxu0 %v332_v53  ;;  %v348_v59 = vld [vmem:[#allocation7 + $0xf8] sm:$0xff]  ;;  %v377_v45 = vld [vmem:[#allocation7 + $0x1e0] sm:$0xff] }
  0x13   :  { %v82_v13 = vand.u32 63, %v74_v6  ;;  %v84_v14 = vand.u32 63, %v76_v7  ;;  %v79_v24 = vand.u32 63, %v71_v10  ;;  %v80_v25 = vand.u32 63, %v72_v11  ;;  %469 = vmatpush.msra.mxu1 %v348_v59  ;;  %v380_v3 = vld [vmem:[#allocation7 + $0x1f8] sm:$0xff]  ;;  %v347_v10 = vld [vmem:[#allocation7 + $0xf0] sm:$0xff] }
  0x14   :  { %v77_v37 = vand.u32 63, %v808_v4  ;;  %v78_v38 = vand.u32 63, %v70_v20  ;;  %v866_v39 = vadd.s32 512, %v808_v4  ;;  %v869_v40 = vadd.s32 768, %v808_v4  ;;  %450 = vmatpush.msra.mxu0 %v331_v54  ;;  %v363_v11 = vld [vmem:[#allocation7 + $0x170] sm:$0xff]  ;;  %509 = vmatpush.msra.mxu3 %v380_v3  ;;  %v346_v20 = vld [vmem:[#allocation7 + $0xe8] sm:$0xff] }
  0x15   :  { %vm836_vm1 = vcmp.eq.s32.totalorder %v82_v13, 0  ;;  %vm840_vm2 = vcmp.eq.s32.totalorder %v84_v14, 0  ;;  %vm852_vm3 = vcmp.eq.s32.totalorder %v82_v13, 63  ;;  %vm856_vm4 = vcmp.eq.s32.totalorder %v84_v14, 63  ;;  %470 = vmatpush.msra.mxu1 %v347_v10  ;;  %v362_v54 = vld [vmem:[#allocation7 + $0x168] sm:$0xff]  ;;  %s615_s9 = sshll.u32 %s768_s8, 4  ;;  %s616_s9 = int_to_ptr.vmem [resolvable:$true] %s615_s9 }
  0x16   :  { %v223_v41 = vperm.slane %v844_v29, 5  ;;  %v225_v42 = vperm.slane %v844_v29, 7  ;;  %vm873_vm5 = vcmp.eq.s32.totalorder %v79_v24, 0  ;;  %vm877_vm6 = vcmp.eq.s32.totalorder %v80_v25, 0  ;;  %v378_v59 = vld [vmem:[#allocation7 + $0x1e8] sm:$0xff]  ;;  %s617_s12 = sshll.u32 %s1142_s4, 4  ;;  %s618_s12 = int_to_ptr.hbm [resolvable:$true] %s617_s12 }
  0x17   :  { %vm881_vm7 = vcmp.eq.s32.totalorder %v79_v24, 63  ;;  %vm885_vm8 = vcmp.eq.s32.totalorder %v80_v25, 63  ;;  %v158_v47 = vperm.slane %v822_v18, 2  ;;  %v159_v48 = vperm.slane %v822_v18, 3  ;;  %471 = vmatpush.msra.mxu1 %v346_v20 }
  0x18   :  { %v258_v49 = vperm.slane %v862_v36, 5  ;;  %v260_v50 = vperm.slane %v862_v36, 7  ;;  %v220_v51 = vperm.slane %v844_v29, 2  ;;  %v221_v52 = vperm.slane %v844_v29, 3 }
  0x19   :  { %vm895_vm9 = vcmp.eq.s32.totalorder %v77_v37, 0  ;;  %vm899_vm10 = vcmp.eq.s32.totalorder %v78_v38, 0  ;;  %v81_v57 = vand.u32 63, %v866_v39  ;;  %v83_v58 = vand.u32 63, %v869_v40  ;;  %v345_v40 = vld [vmem:[#allocation7 + $0xe0] sm:$0xff]  ;;  %v374_v39 = vld [vmem:[#allocation7 + $0x1c8] sm:$0xff] }
  0x1a   :  { %vm905_vm11 = vcmp.eq.s32.totalorder %v77_v37, 63  ;;  %vm909_vm12 = vcmp.eq.s32.totalorder %v78_v38, 63  ;;  %v156_v62 = vperm.slane %v822_v18, 0  ;;  %v157_v6 = vperm.slane %v822_v18, 1  ;;  %472 = vmatpush.msra.mxu1 %v345_v40 }
  0x1b   :  { %v218_v7 = vperm.slane %v844_v29, 0  ;;  %v255_v13 = vperm.slane %v862_v36, 2  ;;  %v256_v14 = vperm.slane %v862_v36, 3  ;;  %v253_v25 = vperm.slane %v862_v36, 0 }
  0x1c   :  { %v254_v37 = vperm.slane %v862_v36, 1  ;;  %vm933_vm13 = vcmp.eq.s32.totalorder %v81_v57, 0  ;;  %vm937_vm14 = vcmp.eq.s32.totalorder %v83_v58, 0  ;;  %vm955_vm15 = vcmp.eq.s32.totalorder %v81_v57, 63 }
  0x1d   :  { %v257_v57 = vperm.slane %v862_v36, 4  ;;  %v1176_v5 = vperm.slane %v844_v29, 6 }
  0x80   :  { %v64_v1 = vpop.permute.xlu0 %63 }
  0x81   :  { %v803_v2 = vsel %vm66_vm0, %v61_v0, %v64_v1  ;;  %v330_v0 = vld [vmem:[#allocation7 + $0x68] sm:$0xff]  ;;  %v364_v1 = vld [vmem:[#allocation7 + $0x178] sm:$0xff]  ;;  %vm967_vm0 = vcmp.eq.s32.totalorder %v83_v58, 63  ;;  %v327_v58 = vld [vmem:[#allocation7 + $0x50] sm:$0xff] }
  0x82   :  { %127 = vrot.lane.b32.xlu1 %v803_v2, %s766_s2  ;;  %93 = vrot.lane.b32.xlu0 %v803_v2, %s767_s5  ;;  %v825_v19 = vmul.f32 %v188_v8, %v803_v2  ;;  %v831_v23 = vmul.f32 %v190_v9, %v803_v2  ;;  %v834_v26 = vmul.f32 %v185_v12, %v803_v2  ;;  %v219_v8 = vperm.slane %v844_v29, 1  ;;  %v379_v12 = vld [vmem:[#allocation7 + $0x1f0] sm:$0xff] }
  0x83   :  { %v847_v30 = vmul.f32 %v186_v15, %v803_v2  ;;  %v850_v31 = vmul.f32 %v183_v16, %v803_v2  ;;  %v915_v63 = vmul.f32 %v184_v17, %v803_v2  ;;  %v921_v9 = vmul.f32 %v187_v21, %v803_v2  ;;  %489 = vmatpush.msra.mxu2 %v364_v1  ;;  %v329_v17 = vld [vmem:[#allocation7 + $0x60] sm:$0xff] }
  0x84   :  { %v160_v15 = vperm.slane %v822_v18, 4  ;;  %v162_v16 = vperm.slane %v822_v18, 6  ;;  %451 = vmatpush.msra.mxu0 %v330_v0  ;;  %510 = vmatpush.msra.mxu3 %v379_v12  ;;  %v361_v12 = vld [vmem:[#allocation7 + $0x160] sm:$0xff] }
  0x85   :  { %490 = vmatpush.msra.mxu2 %v363_v11  ;;  %v328_v11 = vld [vmem:[#allocation7 + $0x58] sm:$0xff]  ;;  %v373_v18 = vld [vmem:[#allocation7 + $0x1c0] sm:$0xff] }
  0x86   :  { %452 = vmatpush.msra.mxu0 %v329_v17  ;;  %511 = vmatpush.msra.mxu3 %v378_v59 }
  0x87   :  { %491 = vmatpush.msra.mxu2 %v362_v54 }
  0x88   :  { %453 = vmatpush.msra.mxu0 %v328_v11  ;;  %512 = vmatpush.msra.mxu3 %v377_v45  ;;  %v341_v45 = vld [vmem:[#allocation7 + $0xc0] sm:$0xff] }
  0x89   :  { %492 = vmatpush.msra.mxu2 %v361_v12  ;;  %v375_v12 = vld [vmem:[#allocation7 + $0x1d0] sm:$0xff] }
  0x8a   :  { %454 = vmatpush.msra.mxu0 %v327_v58 }
  0xf4   :  { %v927_v24 = vpop.permute.xlu1 %127  ;;  %v929_v21 = vpop.permute.xlu0 %93 }
  0xf5   :  { %v116_v1 = vsel %vm836_vm1, 0.0, %v929_v21  ;;  %v118_v3 = vsel %vm840_vm2, 0.0, %v929_v21  ;;  %v151_v10 = vsel %vm852_vm3, 0.0, %v927_v24  ;;  %v153_v53 = vsel %vm856_vm4, 0.0, %v927_v24 }
  0xf6   :  { %v177_v27 = vmul.f32 %v161_v34, %v116_v1  ;;  %v179_v28 = vmul.f32 %v163_v35, %v118_v3  ;;  %v239_v32 = vmul.f32 %v223_v41, %v151_v10  ;;  %v241_v33 = vmul.f32 %v225_v42, %v153_v53  ;;  %v344_v53 = vld [vmem:[#allocation7 + $0xd8] sm:$0xff]  ;;  %v325_v10 = vld [vmem:[#allocation7 + $0x40] sm:$0xff] }
  0xf7   :  { %v113_v34 = vsel %vm873_vm5, 0.0, %v929_v21  ;;  %v114_v35 = vsel %vm877_vm6, 0.0, %v929_v21  ;;  %v148_v41 = vsel %vm881_vm7, 0.0, %v927_v24  ;;  %v149_v42 = vsel %vm885_vm8, 0.0, %v927_v24  ;;  %v360_v3 = vld [vmem:[#allocation7 + $0x158] sm:$0xff]  ;;  %473 = vmatpush.msra.mxu1 %v344_v53  ;;  %v357_v53 = vld [vmem:[#allocation7 + $0x140] sm:$0xff] }
  0xf8   :  { %v212_v17 = vadd.f32 %v825_v19, %v177_v27  ;;  %v214_v43 = vadd.f32 %v831_v23, %v179_v28  ;;  %v174_v20 = vmul.f32 %v158_v47, %v113_v34  ;;  %v175_v44 = vmul.f32 %v159_v48, %v114_v35  ;;  %v326_v47 = vld [vmem:[#allocation7 + $0x48] sm:$0xff]  ;;  %v343_v27 = vld [vmem:[#allocation7 + $0xd0] sm:$0xff]  ;;  %493 = vmatpush.msra.mxu2 %v360_v3  ;;  %v372_v3 = vld [vmem:[#allocation7 + $0x1b8] sm:$0xff] }
  0xf9   :  { %v236_v46 = vmul.f32 %v220_v51, %v148_v41  ;;  %v237_v54 = vmul.f32 %v221_v52, %v149_v42  ;;  %v111_v19 = vsel %vm895_vm9, 0.0, %v929_v21  ;;  %v112_v23 = vsel %vm899_vm10, 0.0, %v929_v21  ;;  %455 = vmatpush.msra.mxu0 %v326_v47  ;;  %474 = vmatpush.msra.mxu1 %v343_v27  ;;  %v354_v27 = vld [vmem:[#allocation7 + $0x128] sm:$0xff] }
  0xfa   :  { %v247_v48 = vadd.f32 %v239_v32, %v212_v17  ;;  %v249_v59 = vadd.f32 %v241_v33, %v214_v43  ;;  %v209_v1 = vadd.f32 %v834_v26, %v174_v20  ;;  %v210_v51 = vadd.f32 %v847_v30, %v175_v44  ;;  %v376_v26 = vld [vmem:[#allocation7 + $0x1d8] sm:$0xff]  ;;  %v323_v43 = vld [vmem:[#allocation7 + $0x30] sm:$0xff] }
  0xfb   :  { %v146_v52 = vsel %vm905_vm11, 0.0, %v927_v24  ;;  %v147_v55 = vsel %vm909_vm12, 0.0, %v927_v24  ;;  %v172_v56 = vmul.f32 %v156_v62, %v111_v19  ;;  %v173_v40 = vmul.f32 %v157_v6, %v112_v23  ;;  %v359_v62 = vld [vmem:[#allocation7 + $0x150] sm:$0xff]  ;;  %v324_v33 = vld [vmem:[#allocation7 + $0x38] sm:$0xff]  ;;  %456 = vmatpush.msra.mxu0 %v325_v10  ;;  %513 = vmatpush.msra.mxu3 %v376_v26 }
  0xfc   :  { %v1013_v30 = vadd.f32 %v258_v49, %v247_v48  ;;  %v1017_v60 = vadd.f32 %v260_v50, %v249_v59  ;;  %v244_v61 = vadd.f32 %v236_v46, %v209_v1  ;;  %v245_v11 = vadd.f32 %v237_v54, %v210_v51  ;;  %494 = vmatpush.msra.mxu2 %v359_v62  ;;  %v321_v59 = vld [vmem:[#allocation7 + $0x20] sm:$0xff]  ;;  %v356_v51 = vld [vmem:[#allocation7 + $0x138] sm:$0xff]  ;;  %v319_v26 = vld [vmem:[#allocation7 + $0x10] sm:$0xff] }
  0xfd   :  { %v207_v28 = vadd.f32 %v850_v31, %v172_v56  ;;  %v208_v6 = vadd.f32 %v915_v63, %v173_v40  ;;  %v234_v32 = vmul.f32 %v218_v7, %v146_v52  ;;  %v235_v49 = vmul.f32 %v219_v8, %v147_v55  ;;  %v342_v63 = vld [vmem:[#allocation7 + $0xc8] sm:$0xff]  ;;  %457 = vmatpush.msra.mxu0 %v324_v33  ;;  %v320_v55 = vld [vmem:[#allocation7 + $0x18] sm:$0xff]  ;;  %v355_v56 = vld [vmem:[#allocation7 + $0x130] sm:$0xff] }
  0xfe   :  { %v282_v50 = vmax.f32 %v1013_v30, 0.0  ;;  %v284_v34 = vmax.f32 %v1017_v60, 0.0  ;;  %v1029_v35 = vadd.f32 %v255_v13, %v244_v61  ;;  %v1033_v31 = vadd.f32 %v256_v14, %v245_v11  ;;  %v358_v7 = vld [vmem:[#allocation7 + $0x148] sm:$0xff]  ;;  %514 = vmatpush.msra.mxu3 %v375_v12  ;;  %475 = vmatpush.msra.mxu1 %v342_v63  ;;  %v371_v40 = vld [vmem:[#allocation7 + $0x1b0] sm:$0xff]  ;;  %v369_v33 = vld [vmem:[#allocation7 + $0x1a0] sm:$0xff] }
  0xff   :  { %v242_v8 = vadd.f32 %v234_v32, %v207_v28  ;;  %v243_v41 = vadd.f32 %v235_v49, %v208_v6  ;;  %v115_v42 = vsel %vm933_vm13, 0.0, %v929_v21  ;;  %v117_v58 = vsel %vm937_vm14, 0.0, %v929_v21  ;;  %495 = vmatpush.msra.mxu2 %v358_v7  ;;  %458 = vmatpush.msra.mxu0 %v323_v43  ;;  %v338_v61 = vld [vmem:[#allocation7 + $0xa8] sm:$0xff]  ;;  %v337_v32 = vld [vmem:[#allocation7 + $0xa0] sm:$0xff]  ;;  %v396_v7 = vld [vmem:[#allocation7 + $0x278] sm:$0xff] }
 0x100   :  { %v652_v13 = vpack.i.bf16 %v282_v50, %v284_v34  ;;  %v279_v14 = vmax.f32 %v1029_v35, 0.0  ;;  %v280_v17 = vmax.f32 %v1033_v31, 0.0  ;;  %v150_v38 = vsel %vm955_vm15, 0.0, %v927_v24  ;;  %515 = vmatpush.msra.mxu3 %v374_v39  ;;  %476 = vmatpush.msra.mxu1 %v341_v45  ;;  %v370_v62 = vld [vmem:[#allocation7 + $0x1a8] sm:$0xff]  ;;  %v353_v49 = vld [vmem:[#allocation7 + $0x120] sm:$0xff]  ;;  %v367_v43 = vld [vmem:[#allocation7 + $0x190] sm:$0xff] }
 0x101   :  { %v1052_v21 = vadd.f32 %v253_v25, %v242_v8  ;;  %v1056_v20 = vadd.f32 %v254_v37, %v243_v41  ;;  %v152_v44 = vsel %vm967_vm0, 0.0, %v927_v24  ;;  %v176_v0 = vmul.f32 %v160_v15, %v115_v42  ;;  %v322_v15 = vld [vmem:[#allocation7 + $0x28] sm:$0xff]  ;;  %496 = vmatpush.msra.mxu2 %v357_v53  ;;  %v317_v12 = vld [vmem:[#allocation7] sm:$0xff]  ;;  %v336_v8 = vld [vmem:[#allocation7 + $0x98] sm:$0xff] }
 0x102   :  { %653 = vrot.lane.b32.xlu0 %v652_v13, %s766_s2  ;;  %v637_v25 = vpack.i.bf16 %v280_v17, %v279_v14  ;;  %v178_v37 = vmul.f32 %v162_v16, %v117_v58  ;;  %v205_v24 = vmul.f32 %v189_v22, %v803_v2  ;;  %v1175_v23 = vperm.slane %v844_v29, 4  ;;  %v340_v16 = vld [vmem:[#allocation7 + $0xb8] sm:$0xff]  ;;  %459 = vmatpush.msra.mxu0 %v322_v15  ;;  %v339_v29 = vld [vmem:[#allocation7 + $0xb0] sm:$0xff]  ;;  %v318_v6 = vld [vmem:[#allocation7 + $0x8] sm:$0xff] }
 0x103   :  { %v277_v46 = vmax.f32 %v1052_v21, 0.0  ;;  %v278_v54 = vmax.f32 %v1056_v20, 0.0  ;;  %v211_v19 = vadd.f32 %v921_v9, %v176_v0  ;;  %v240_v22 = vmul.f32 %v1176_v5, %v152_v44  ;;  %516 = vmatpush.msra.mxu3 %v373_v18  ;;  %477 = vmatpush.msra.mxu1 %v340_v16  ;;  %v352_v41 = vld [vmem:[#allocation7 + $0x118] sm:$0xff]  ;;  %v395_v58 = vld [vmem:[#allocation7 + $0x270] sm:$0xff]  ;;  %v394_v39 = vld [vmem:[#allocation7 + $0x268] sm:$0xff] }
 0x104   :  { %v238_v47 = vmul.f32 %v1175_v23, %v150_v38  ;;  %638 = vrot.lane.b32.xlu1 %v637_v25, %s766_s2  ;;  %v213_v2 = vadd.f32 %v205_v24, %v178_v37  ;;  %v259_v48 = vperm.slane %v862_v36, 6  ;;  %460 = vmatpush.msra.mxu0 %v321_v59  ;;  %v368_v42 = vld [vmem:[#allocation7 + $0x198] sm:$0xff]  ;;  %v335_v13 = vld [vmem:[#allocation7 + $0x90] sm:$0xff]  ;;  %v334_v44 = vld [vmem:[#allocation7 + $0x88] sm:$0xff]  ;;  %vm129_vm1 = vcmp.lt.s32.totalorder %v808_v4, 127 }
 0x105   :  { %v642_v9 = vpack.i.bf16 %v278_v54, %v277_v46  ;;  %497 = vmatpush.msra.mxu2 %v356_v51  ;;  %517 = vmatpush.msra.mxu3 %v372_v3  ;;  %v351_v38 = vld [vmem:[#allocation7 + $0x110] sm:$0xff]  ;;  %v350_v0 = vld [vmem:[#allocation7 + $0x108] sm:$0xff]  ;;  %v393_v25 = vld [vmem:[#allocation7 + $0x260] sm:$0xff] }
 0x106   :  { %v246_v1 = vadd.f32 %v238_v47, %v211_v19  ;;  %v248_v52 = vadd.f32 %v240_v22, %v213_v2  ;;  %461 = vmatpush.msra.mxu0 %v320_v55  ;;  %478 = vmatpush.msra.mxu1 %v339_v29  ;;  %v366_v45 = vld [vmem:[#allocation7 + $0x188] sm:$0xff]  ;;  %v333_v37 = vld [vmem:[#allocation7 + $0x80] sm:$0xff]  ;;  %v392_v15 = vld [vmem:[#allocation7 + $0x258] sm:$0xff] }
 0x107   :  { %643 = vrot.lane.b32.xlu2 %v642_v9, %s766_s2  ;;  %498 = vmatpush.msra.mxu2 %v355_v56  ;;  %v349_v24 = vld [vmem:[#allocation7 + $0x100] sm:$0xff]  ;;  %v412_v53 = vld [vmem:[#allocation7 + $0x2f8] sm:$0xff]  ;;  %v391_v47 = vld [vmem:[#allocation7 + $0x250] sm:$0xff] }
 0x108   :  { %v1088_v36 = vadd.f32 %v257_v57, %v246_v1  ;;  %v1090_v10 = vadd.f32 %v259_v48, %v248_v52  ;;  %518 = vmatpush.msra.mxu3 %v371_v40  ;;  %462 = vmatpush.msra.mxu0 %v319_v26  ;;  %v365_v57 = vld [vmem:[#allocation7 + $0x180] sm:$0xff]  ;;  %v428_v19 = vld [vmem:[#allocation7 + $0x378] sm:$0xff]  ;;  %v411_v18 = vld [vmem:[#allocation7 + $0x2f0] sm:$0xff] }
 0x109   :  { %479 = vmatpush.msra.mxu1 %v338_v61  ;;  %499 = vmatpush.msra.mxu2 %v354_v27  ;;  %v444_v23 = vld [vmem:[#allocation7 + $0x3f8] sm:$0xff]  ;;  %v427_v16 = vld [vmem:[#allocation7 + $0x370] sm:$0xff]  ;;  %v390_v5 = vld [vmem:[#allocation7 + $0x248] sm:$0xff] }
 0x10a   :  { %v281_v11 = vmax.f32 %v1088_v36, 0.0  ;;  %v283_v28 = vmax.f32 %v1090_v10, 0.0  ;;  %519 = vmatpush.msra.mxu3 %v370_v62  ;;  %463 = vmatpush.msra.mxu0 %v318_v6  ;;  %v443_v2 = vld [vmem:[#allocation7 + $0x3f0] sm:$0xff]  ;;  %v410_v22 = vld [vmem:[#allocation7 + $0x2e8] sm:$0xff]  ;;  %v389_v9 = vld [vmem:[#allocation7 + $0x240] sm:$0xff] }
 0x10b   :  { %480 = vmatpush.msra.mxu1 %v337_v32  ;;  %500 = vmatpush.msra.mxu2 %v353_v49  ;;  %v426_v48 = vld [vmem:[#allocation7 + $0x368] sm:$0xff]  ;;  %v409_v1 = vld [vmem:[#allocation7 + $0x2e0] sm:$0xff]  ;;  %v388_v52 = vld [vmem:[#allocation7 + $0x238] sm:$0xff] }
 0x10c   :  { %v647_v63 = vpack.i.bf16 %v283_v28, %v281_v11  ;;  %520 = vmatpush.msra.mxu3 %v369_v33  ;;  %464 = vmatpush.msra.mxu0 %v317_v12  ;;  %v442_v59 = vld [vmem:[#allocation7 + $0x3e8] sm:$0xff]  ;;  %v425_v51 = vld [vmem:[#allocation7 + $0x360] sm:$0xff]  ;;  %v408_v55 = vld [vmem:[#allocation7 + $0x2d8] sm:$0xff] }
 0x10d   :  { %481 = vmatpush.msra.mxu1 %v336_v8  ;;  %501 = vmatpush.msra.mxu2 %v352_v41  ;;  %v441_v3 = vld [vmem:[#allocation7 + $0x3e0] sm:$0xff]  ;;  %v424_v29 = vld [vmem:[#allocation7 + $0x358] sm:$0xff]  ;;  %v387_v40 = vld [vmem:[#allocation7 + $0x230] sm:$0xff] }
 0x10e   :  { %529 = vmatpush.msrb.mxu0 %v396_v7  ;;  %521 = vmatpush.msra.mxu3 %v368_v42  ;;  %v440_v56 = vld [vmem:[#allocation7 + $0x3d8] sm:$0xff]  ;;  %v407_v26 = vld [vmem:[#allocation7 + $0x2d0] sm:$0xff]  ;;  %v386_v62 = vld [vmem:[#allocation7 + $0x228] sm:$0xff] }
 0x10f   :  { %648 = vrot.lane.b32.xlu2 %v647_v63, %s766_s2  ;;  %482 = vmatpush.msra.mxu1 %v335_v13  ;;  %v423_v61 = vld [vmem:[#allocation7 + $0x350] sm:$0xff]  ;;  %v406_v6 = vld [vmem:[#allocation7 + $0x2c8] sm:$0xff]  ;;  %v385_v33 = vld [vmem:[#allocation7 + $0x220] sm:$0xff] }
 0x110   :  { %530 = vmatpush.msrb.mxu0 %v395_v58  ;;  %502 = vmatpush.msra.mxu2 %v351_v38  ;;  %v439_v27 = vld [vmem:[#allocation7 + $0x3d0] sm:$0xff]  ;;  %v422_v32 = vld [vmem:[#allocation7 + $0x348] sm:$0xff]  ;;  %v405_v12 = vld [vmem:[#allocation7 + $0x2c0] sm:$0xff] }
 0x111   :  { %522 = vmatpush.msra.mxu3 %v367_v43  ;;  %483 = vmatpush.msra.mxu1 %v334_v44  ;;  %v438_v49 = vld [vmem:[#allocation7 + $0x3c8] sm:$0xff]  ;;  %v421_v63 = vld [vmem:[#allocation7 + $0x340] sm:$0xff]  ;;  %v384_v8 = vld [vmem:[#allocation7 + $0x218] sm:$0xff] }
 0x112   :  { %531 = vmatpush.msrb.mxu0 %v394_v39  ;;  %503 = vmatpush.msra.mxu2 %v350_v0  ;;  %v437_v7 = vld [vmem:[#allocation7 + $0x3c0] sm:$0xff]  ;;  %v404_v41 = vld [vmem:[#allocation7 + $0x2b8] sm:$0xff]  ;;  %v383_v13 = vld [vmem:[#allocation7 + $0x210] sm:$0xff] }
 0x113   :  { %523 = vmatpush.msra.mxu3 %v366_v45  ;;  %484 = vmatpush.msra.mxu1 %v333_v37  ;;  %v420_v42 = vld [vmem:[#allocation7 + $0x338] sm:$0xff]  ;;  %v403_v38 = vld [vmem:[#allocation7 + $0x2b0] sm:$0xff]  ;;  %v382_v44 = vld [vmem:[#allocation7 + $0x208] sm:$0xff] }
 0x114   :  { %532 = vmatpush.msrb.mxu0 %v393_v25  ;;  %504 = vmatpush.msra.mxu2 %v349_v24  ;;  %v436_v58 = vld [vmem:[#allocation7 + $0x3b8] sm:$0xff]  ;;  %v419_v43 = vld [vmem:[#allocation7 + $0x330] sm:$0xff]  ;;  %v402_v0 = vld [vmem:[#allocation7 + $0x2a8] sm:$0xff] }
 0x115   :  { %524 = vmatpush.msra.mxu3 %v365_v57  ;;  %549 = vmatpush.msrb.mxu1 %v412_v53  ;;  %v435_v39 = vld [vmem:[#allocation7 + $0x3b0] sm:$0xff]  ;;  %v418_v45 = vld [vmem:[#allocation7 + $0x328] sm:$0xff]  ;;  %v381_v37 = vld [vmem:[#allocation7 + $0x200] sm:$0xff] }
 0x116   :  { %533 = vmatpush.msrb.mxu0 %v392_v15  ;;  %569 = vmatpush.msrb.mxu2 %v428_v19  ;;  %v434_v25 = vld [vmem:[#allocation7 + $0x3a8] sm:$0xff]  ;;  %v401_v24 = vld [vmem:[#allocation7 + $0x2a0] sm:$0xff]  ;;  %v400_v53 = vld [vmem:[#allocation7 + $0x298] sm:$0xff] }
 0x117   :  { %589 = vmatpush.msrb.mxu3 %v444_v23  ;;  %550 = vmatpush.msrb.mxu1 %v411_v18  ;;  %v417_v57 = vld [vmem:[#allocation7 + $0x320] sm:$0xff]  ;;  %v416_v19 = vld [vmem:[#allocation7 + $0x318] sm:$0xff]  ;;  %v399_v18 = vld [vmem:[#allocation7 + $0x290] sm:$0xff] }
 0x118   :  { %534 = vmatpush.msrb.mxu0 %v391_v47  ;;  %570 = vmatpush.msrb.mxu2 %v427_v16  ;;  %v433_v15 = vld [vmem:[#allocation7 + $0x3a0] sm:$0xff]  ;;  %v432_v23 = vld [vmem:[#allocation7 + $0x398] sm:$0xff]  ;;  %v415_v16 = vld [vmem:[#allocation7 + $0x310] sm:$0xff] }
 0x119   :  { %590 = vmatpush.msrb.mxu3 %v443_v2  ;;  %551 = vmatpush.msrb.mxu1 %v410_v22  ;;  %v431_v22 = vld [vmem:[#allocation7 + $0x390] sm:$0xff] }
 0x11a   :  { %535 = vmatpush.msrb.mxu0 %v390_v5  ;;  %571 = vmatpush.msrb.mxu2 %v426_v48  ;;  %v398_v48 = vld [vmem:[#allocation7 + $0x288] sm:$0xff] }
 0x11b   :  { %591 = vmatpush.msrb.mxu3 %v442_v59  ;;  %552 = vmatpush.msrb.mxu1 %v409_v1  ;;  %v414_v59 = vld [vmem:[#allocation7 + $0x308] sm:$0xff] }
 0x11c   :  { %536 = vmatpush.msrb.mxu0 %v389_v9  ;;  %572 = vmatpush.msrb.mxu2 %v425_v51  ;;  %v430_v1 = vld [vmem:[#allocation7 + $0x388] sm:$0xff] }
 0x11d   :  { %592 = vmatpush.msrb.mxu3 %v441_v3  ;;  %553 = vmatpush.msrb.mxu1 %v408_v55  ;;  %v397_v3 = vld [vmem:[#allocation7 + $0x280] sm:$0xff] }
 0x11e   :  { %537 = vmatpush.msrb.mxu0 %v388_v52  ;;  %573 = vmatpush.msrb.mxu2 %v424_v29  ;;  %v413_v52 = vld [vmem:[#allocation7 + $0x300] sm:$0xff] }
 0x11f   :  { %593 = vmatpush.msrb.mxu3 %v440_v56  ;;  %554 = vmatpush.msrb.mxu1 %v407_v26  ;;  %v429_v55 = vld [vmem:[#allocation7 + $0x380] sm:$0xff] }
 0x120   :  { %538 = vmatpush.msrb.mxu0 %v387_v40  ;;  %574 = vmatpush.msrb.mxu2 %v423_v61 }
 0x121   :  { %594 = vmatpush.msrb.mxu3 %v439_v27  ;;  %555 = vmatpush.msrb.mxu1 %v406_v6 }
 0x122   :  { %539 = vmatpush.msrb.mxu0 %v386_v62  ;;  %575 = vmatpush.msrb.mxu2 %v422_v32 }
 0x123   :  { %595 = vmatpush.msrb.mxu3 %v438_v49  ;;  %556 = vmatpush.msrb.mxu1 %v405_v12 }
 0x124   :  { %540 = vmatpush.msrb.mxu0 %v385_v33  ;;  %576 = vmatpush.msrb.mxu2 %v421_v63 }
 0x125   :  { %596 = vmatpush.msrb.mxu3 %v437_v7  ;;  %557 = vmatpush.msrb.mxu1 %v404_v41 }
 0x126   :  { %541 = vmatpush.msrb.mxu0 %v384_v8  ;;  %577 = vmatpush.msrb.mxu2 %v420_v42 }
 0x127   :  { %597 = vmatpush.msrb.mxu3 %v436_v58  ;;  %558 = vmatpush.msrb.mxu1 %v403_v38 }
 0x128   :  { %542 = vmatpush.msrb.mxu0 %v383_v13  ;;  %578 = vmatpush.msrb.mxu2 %v419_v43 }
 0x129   :  { %598 = vmatpush.msrb.mxu3 %v435_v39  ;;  %559 = vmatpush.msrb.mxu1 %v402_v0 }
 0x12a   :  { %543 = vmatpush.msrb.mxu0 %v382_v44  ;;  %579 = vmatpush.msrb.mxu2 %v418_v45 }
 0x12b   :  { %599 = vmatpush.msrb.mxu3 %v434_v25  ;;  %560 = vmatpush.msrb.mxu1 %v401_v24 }
 0x12c   :  { %544 = vmatpush.msrb.mxu0 %v381_v37  ;;  %580 = vmatpush.msrb.mxu2 %v417_v57 }
 0x12d   :  { %600 = vmatpush.msrb.mxu3 %v433_v15  ;;  %561 = vmatpush.msrb.mxu1 %v400_v53 }
 0x12e   :  { %581 = vmatpush.msrb.mxu2 %v416_v19 }
 0x12f   :  { %601 = vmatpush.msrb.mxu3 %v432_v23  ;;  %562 = vmatpush.msrb.mxu1 %v399_v18 }
 0x130   :  { %582 = vmatpush.msrb.mxu2 %v415_v16 }
 0x131   :  { %602 = vmatpush.msrb.mxu3 %v431_v22  ;;  %563 = vmatpush.msrb.mxu1 %v398_v48 }
 0x132   :  { %583 = vmatpush.msrb.mxu2 %v414_v59 }
 0x133   :  { %603 = vmatpush.msrb.mxu3 %v430_v1  ;;  %564 = vmatpush.msrb.mxu1 %v397_v3 }
 0x134   :  { %584 = vmatpush.msrb.mxu2 %v413_v52 }
 0x135   :  { %604 = vmatpush.msrb.mxu3 %v429_v55 }
 0x161   :  { %v644_v47 = vpop.permute.xlu2 %643 }
 0x162   :  { %v646_v2 = vunpack.i.h.bf16 %v644_v47  ;;  %v645_v5 = vunpack.i.l.bf16 %v644_v47 }
 0x164   :  { %v307_v9 = vsel %vm129_vm1, %v645_v5, %v646_v2 }
 0x165   :  { %v309_v51 = vmax.f32 %v277_v46, %v307_v9 }
 0x167   :  { %465 = vmatmul.f32.vlgmr.msra.gmra.mxu0 %v309_v51 }
 0x169   :  { %v649_v29 = vpop.permute.xlu2 %648 }
 0x16a   :  { %v650_v40 = vunpack.i.l.bf16 %v649_v29 }
 0x174   :  { %v654_v56 = vpop.permute.xlu0 %653 }
 0x175   :  { %v656_v26 = vunpack.i.h.bf16 %v654_v56  ;;  %v655_v36 = vunpack.i.l.bf16 %v654_v56 }
 0x176   :  { %v639_v61 = vpop.permute.xlu1 %638 }
 0x177   :  { %v641_v27 = vunpack.i.h.bf16 %v639_v61  ;;  %v640_v62 = vunpack.i.l.bf16 %v639_v61  ;;  %v303_v21 = vsel %vm129_vm1, %v650_v40, %v656_v26  ;;  %v308_v20 = vsel %vm129_vm1, %v655_v36, %v645_v5 }
 0x178   :  { %v313_v46 = vmax.f32 %v281_v11, %v303_v21  ;;  %v651_v11 = vunpack.i.h.bf16 %v649_v29 }
 0x179   :  { %v306_v6 = vsel %vm129_vm1, %v646_v2, %v640_v62  ;;  %v305_v32 = vsel %vm129_vm1, %v640_v62, %v641_v27  ;;  %v304_v49 = vsel %vm129_vm1, %v641_v27, %v650_v40 }
 0x17a   :  { %v310_v33 = vmax.f32 %v278_v54, %v306_v6  ;;  %v311_v12 = vmax.f32 %v279_v14, %v305_v32  ;;  %v312_v63 = vmax.f32 %v280_v17, %v304_v49  ;;  %545 = vmatmul.f32.vlgmr.msrb.gmra.mxu0 %v313_v46  ;;  %v302_v7 = vsel %vm129_vm1, %v656_v26, %v651_v11  ;;  %v657_v17 = vld [vmem:[%s1141_s3] ss:$0 sm:$0xff] }
 0x17b   :  { %v301_v8 = vsel %vm129_vm1, %v651_v11, %v655_v36  ;;  %v314_v35 = vmax.f32 %v282_v50, %v302_v7  ;;  %v316_v14 = vmax.f32 %v284_v34, %v308_v20 }
 0x17c   :  { %485 = vmatmul.f32.vlgmr.msra.gmra.mxu1 %v310_v33  ;;  %505 = vmatmul.f32.vlgmr.msra.gmra.mxu2 %v311_v12  ;;  %v315_v31 = vmax.f32 %v283_v28, %v301_v8 }
 0x17d   :  { %525 = vmatmul.f32.vlgmr.msra.gmra.mxu3 %v312_v63 }
 0x184   :  { %565 = vmatmul.f32.vlgmr.msrb.gmra.mxu1 %v314_v35  ;;  %585 = vmatmul.f32.vlgmr.msrb.gmra.mxu2 %v315_v31 }
 0x185   :  { %605 = vmatmul.f32.vlgmr.msrb.gmra.mxu3 %v316_v14 }
 0x1e4   :  { %v466_v54 = vpop.f32.mrf.mxu0 }
 0x1e5   :  { %v467_v4 = vadd.f32 %v657_v17, %v466_v54 }
 0x1f7   :  { %v546_v10 = vpop.f32.mrf.mxu0 }
 0x1f9   :  { %v486_v41 = vpop.f32.mrf.mxu1 }
 0x1fa   :  { %v487_v42 = vadd.f32 %v486_v41, %v467_v4 }
 0x1ff   :  { %v506_v58 = vpop.f32.mrf.mxu2 }
 0x200   :  { %v507_v30 = vadd.f32 %v506_v58, %v487_v42  ;;  %v526_v50 = vpop.f32.mrf.mxu3 }
 0x201   :  { %v566_v38 = vpop.f32.mrf.mxu1 }
 0x202   :  { %v527_v13 = vadd.f32 %v526_v50, %v507_v30 }
 0x204   :  { %v547_v28 = vadd.f32 %v546_v10, %v527_v13 }
 0x206   :  { %v567_v60 = vadd.f32 %v566_v38, %v547_v28 }
 0x207   :  { %v586_v34 = vpop.f32.mrf.mxu2 }
 0x208   :  { %v587_v43 = vadd.f32 %v586_v34, %v567_v60  ;;  %v606_v39 = vpop.f32.mrf.mxu3 }
 0x20a   :  { %v607_v44 = vadd.f32 %v606_v39, %v587_v43 }
 0x20c   :  { %609 = vst [vmem:[#allocation8] sm:$0xff] %v607_v44 }
 0x20d   :  { %620 = dma.vmem_to_hbm [thread:$0]  %s616_s9, 128, %s618_s12, [#allocation4]  }
 0x20e   :  { %758 = dma.done.wait [#allocation4], 128  }
 0x20f   :  { %759 = vsyncadd [#allocation4], 4294967168 }
 0x210   :  { %625 = vsyncpa [#allocation3], 1 }
 0x211   :  { %626 = vsyncpa [#allocation6], 1 }
 0x212   :  { %627 = vsyncpa [#allocation4], 1 }

</bundles_post_ra>
